<compile_context>
chip_gen: v7x
topology: tpu7x:2x2x1
jax: 0.10.0
libtpu: 0.0.40
codegen_flags: <defaults>
</compile_context>

<pallas_src>
import jax
import jax.numpy as jnp
from jax.experimental import pallas as pl
from jax.experimental.pallas import tpu as pltpu


def _make_policy_kernel(n_actions):
    """Kernel factory; n_actions is baked in (output slab is 128-padded)."""

    def kernel(x_ref, w1_ref, vecs_ref, wh_ref, bh_ref, out_ref):
        x = x_ref[...]                               # (Bt, S) f32
        vecs = vecs_ref[...]                         # (3, H): b1, gamma, beta

        # ---- hidden layer: Linear -> LeakyReLU -> LayerNorm (all f32) ------
        h = jnp.dot(x.astype(w1_ref.dtype), w1_ref[...],
                    preferred_element_type=jnp.float32)
        h = h + vecs[0:1, :]                         # bias b1
        h = jnp.where(h >= 0, h, 0.01 * h)           # LeakyReLU (slope 0.01)

        # LayerNorm (eps=1e-5, affine).  Two direct XLU reductions; variance
        # via mean((h - mu)^2) so it can never go negative.
        inv_h = 1.0 / h.shape[-1]
        mu = jnp.sum(h, axis=-1, keepdims=True) * inv_h
        c = h - mu
        var = jnp.sum(c * c, axis=-1, keepdims=True) * inv_h
        hn = c * jax.lax.rsqrt(var + 1e-5) * vecs[1:2, :] + vecs[2:3, :]

        # ---- fused, 128-padded heads: one (H, 128k) matmul ------------------
        z = jnp.dot(hn.astype(wh_ref.dtype), wh_ref[...],
                    preferred_element_type=jnp.float32) + bh_ref[...]

        # Stable softplus + clamp(min=1e-3) on every lane (EUP slot ~ free);
        # keep the raw logits in the mean columns [0, A).  Padding columns
        # (>= 2A) are garbage and sliced off by the wrapper.
        sp = jnp.maximum(z, 0.0) + jnp.log1p(jnp.exp(-jnp.abs(z)))
        std = jnp.maximum(sp, 0.001)
        col = jax.lax.broadcasted_iota(jnp.int32, z.shape, 1)
        out_ref[...] = jnp.where(col < n_actions, z, std).astype(out_ref.dtype)

    return kernel


def policy_continuous_forward(x, kparams, *, block_b=8192):
    """x: (B, n_states) f32.  kparams: packed params (see pack_params).
    Returns (mean, std), each (B, n_actions) f32."""
    B, S = x.shape
    H = kparams["w1"].shape[1]
    n_actions = int(kparams["n_actions"])
    padded_cols = kparams["w_heads"].shape[1]        # multiple of 128
    kernel = _make_policy_kernel(n_actions)
    args = (kparams["w1"], kparams["vecs"], kparams["w_heads"], kparams["b_heads"])

    if B <= block_b:
        # Single grid point: every operand whole in VMEM, zero pipeline
        # overhead.  At ~2 KB/row this is safe well past 8k rows even within
        # v7x's 32 MiB scoped-VMEM default.
        vmem = pl.BlockSpec(memory_space=pltpu.MemorySpace.VMEM)
        packed = pl.pallas_call(
            kernel,
            out_shape=jax.ShapeDtypeStruct((B, padded_cols), jnp.float32),
            in_specs=[vmem] * 5,
            out_specs=vmem,
        )(x, *args)
    else:
        # Large batch: split into the MINIMAL number of equal, sublane-aligned
        # blocks (e.g. exactly 2 just above block_b -> one block per
        # TensorCore on v7x).  Weights stay VMEM-resident via constant index
        # maps.  Remainders are handled by zero-padding B in the wrapper.
        num_blocks = pl.cdiv(B, block_b)
        bb = ((pl.cdiv(B, num_blocks) + 7) // 8) * 8
        num_blocks = pl.cdiv(B, bb)
        b_pad = num_blocks * bb
        x_in = x if b_pad == B else jnp.pad(x, ((0, b_pad - B), (0, 0)))
        packed = pl.pallas_call(
            kernel,
            out_shape=jax.ShapeDtypeStruct((b_pad, padded_cols), jnp.float32),
            grid=(num_blocks,),
            in_specs=[
                pl.BlockSpec((bb, S), lambda i: (i, 0)),
                pl.BlockSpec((S, H), lambda i: (0, 0)),
                pl.BlockSpec((3, H), lambda i: (0, 0)),
                pl.BlockSpec((H, padded_cols), lambda i: (0, 0)),
                pl.BlockSpec((1, padded_cols), lambda i: (0, 0)),
            ],
            out_specs=pl.BlockSpec((bb, padded_cols), lambda i: (i, 0)),
            compiler_params=pltpu.CompilerParams(
                dimension_semantics=("parallel",)),
        )(x_in, *args)
        packed = packed[:B]

    return packed[:, :n_actions], packed[:, n_actions:2 * n_actions]


def init_torch_params(key, n_states, n_actions, hidden_dim):
    """PyTorch-style f32 params: nn.Linear default init U(-1/sqrt(fan_in), ..),
    LayerNorm gamma=1 / beta=0.  Weights stored [in_features, out_features]."""
    ks = jax.random.split(key, 6)

    def lin(kw, kb, fan_in, fan_out):
        bound = 1.0 / jnp.sqrt(fan_in)
        w = jax.random.uniform(kw, (fan_in, fan_out), jnp.float32, -bound, bound)
        b = jax.random.uniform(kb, (1, fan_out), jnp.float32, -bound, bound)
        return w, b

    w1, b1 = lin(ks[0], ks[1], n_states, hidden_dim)
    wm, bm = lin(ks[2], ks[3], hidden_dim, n_actions)
    ws, bs = lin(ks[4], ks[5], hidden_dim, n_actions)
    return {
        "w1": w1, "b1": b1,
        "gamma": jnp.ones((1, hidden_dim), jnp.float32),
        "beta": jnp.zeros((1, hidden_dim), jnp.float32),
        "wm": wm, "bm": bm, "ws": ws, "bs": bs,
    }


def pack_params(p, matmul_dtype=jnp.float32):
    """Fuse / pack params for the kernel.
    - Heads (mean, std) fused and zero-padded to a lane-dense (H, 128k) matmul.
    - b1 / gamma / beta packed into one (3, H) array.
    - matmul_dtype=float32 by default (exact); bf16 is an explicit opt-in."""
    H = p["w1"].shape[1]
    n_actions = p["wm"].shape[1]
    two_a = 2 * n_actions
    padded_cols = max(128, ((two_a + 127) // 128) * 128)

    w_heads = jnp.zeros((H, padded_cols), jnp.float32)
    w_heads = w_heads.at[:, :n_actions].set(p["wm"])
    w_heads = w_heads.at[:, n_actions:two_a].set(p["ws"])
    b_heads = jnp.zeros((1, padded_cols), jnp.float32)
    b_heads = b_heads.at[:, :n_actions].set(p["bm"])
    b_heads = b_heads.at[:, n_actions:two_a].set(p["bs"])

    return {
        "w1": p["w1"].astype(matmul_dtype),                                  # (S, H)
        "vecs": jnp.concatenate([p["b1"], p["gamma"], p["beta"]], axis=0),   # (3, H)
        "w_heads": w_heads.astype(matmul_dtype),                             # (H, 128k)
        "b_heads": b_heads,                                                  # (1, 128k)
        "n_actions": n_actions,
    }


def _reference(x, p):
    """Pure-JAX f32 reference matching the PyTorch module."""
    h = x @ p["w1"] + p["b1"]
    h = jnp.where(h >= 0, h, 0.01 * h)
    mu = jnp.mean(h, axis=-1, keepdims=True)
    var = jnp.mean((h - mu) ** 2, axis=-1, keepdims=True)
    h = (h - mu) / jnp.sqrt(var + 1e-5) * p["gamma"] + p["beta"]
    mean = h @ p["wm"] + p["bm"]
    std = jnp.maximum(jax.nn.softplus(h @ p["ws"] + p["bs"]), 0.001)
    return mean, std


if __name__ == "__main__":
    key = jax.random.PRNGKey(0)
    k_x, k_p, k_big = jax.random.split(key, 3)

    B, n_states, n_actions, hidden = 8, 16, 4, 64
    x = jax.random.normal(k_x, (B, n_states), jnp.float32)
    tparams = init_torch_params(k_p, n_states, n_actions, hidden)
    mean_ref, std_ref = _reference(x, tparams)

    # ---- default path: f32 matmuls, single grid point, lane-dense output ----
    kparams = pack_params(tparams)
    mean, std = policy_continuous_forward(x, kparams)
    jax.block_until_ready((mean, std))
    assert mean.shape == (B, n_actions) and std.shape == (B, n_actions)
    assert jnp.allclose(mean, mean_ref, atol=1e-4, rtol=1e-4)
    assert jnp.allclose(std, std_ref, atol=1e-4, rtol=1e-4)
    assert bool(jnp.all(std >= 0.001))

    # ---- opt-in bf16 matmul inputs (looser tolerance by construction) -------
    mean_bf, std_bf = policy_continuous_forward(x, pack_params(tparams, jnp.bfloat16))
    jax.block_until_ready((mean_bf, std_bf))
    assert jnp.allclose(mean_bf, mean_ref, atol=5e-2, rtol=5e-2)
    assert jnp.allclose(std_bf, std_ref, atol=5e-2, rtol=5e-2)

    # ---- large-batch gridded path (forced small block_b), ragged B ----------
    B_big = 1000                           # not a multiple of the block size
    x_big = jax.random.normal(k_big, (B_big, n_states), jnp.float32)
    mean_b, std_b = policy_continuous_forward(x_big, kparams, block_b=256)
    jax.block_until_ready((mean_b, std_b))
    mean_bref, std_bref = _reference(x_big, tparams)
    assert mean_b.shape == (B_big, n_actions)
    assert jnp.allclose(mean_b, mean_bref, atol=1e-4, rtol=1e-4)
    assert jnp.allclose(std_b, std_bref, atol=1e-4, rtol=1e-4)
    assert bool(jnp.all(std_b >= 0.001))

    print("KERNEL_OK")
</pallas_src>

<mosaic_0001>
module attributes {stable_mosaic.version = 11 : i64} {
  func.func @kernel(%arg0: memref<8x16xf32, #tpu.memory_space<vmem>>, %arg1: memref<16x64xf32, #tpu.memory_space<vmem>>, %arg2: memref<3x64xf32, #tpu.memory_space<vmem>>, %arg3: memref<64x128xf32, #tpu.memory_space<vmem>>, %arg4: memref<1x128xf32, #tpu.memory_space<vmem>>, %arg5: memref<8x128xf32, #tpu.memory_space<vmem>>) attributes {dimension_semantics = [], scalar_prefetch = 0 : i64, scratch_operands = 0 : i64, tpu.core_type = #tpu.core_type<tc>} {
    %c0 = arith.constant 0 : index
    %c0_0 = arith.constant 0 : index
    %0 = vector.load %arg0[%c0, %c0_0] : memref<8x16xf32, #tpu.memory_space<vmem>>, vector<8x16xf32>
    %c0_1 = arith.constant 0 : index
    %c0_2 = arith.constant 0 : index
    %1 = vector.load %arg2[%c0_1, %c0_2] : memref<3x64xf32, #tpu.memory_space<vmem>>, vector<3x64xf32>
    %c0_3 = arith.constant 0 : index
    %c0_4 = arith.constant 0 : index
    %2 = vector.load %arg1[%c0_3, %c0_4] : memref<16x64xf32, #tpu.memory_space<vmem>>, vector<16x64xf32>
    %cst = arith.constant dense<0.000000e+00> : vector<8x64xf32>
    %3 = tpu.matmul %0, %2, %cst {dimension_numbers = #tpu.dot_dimension_numbers<[1], [0], [0], [1], [0, 0, 1, 1], [], []>} : vector<8x16xf32>, vector<16x64xf32>, vector<8x64xf32> -> vector<8x64xf32>
    %4 = vector.extract_strided_slice %1 {offsets = [0, 0], sizes = [1, 64], strides = [1, 1]} : vector<3x64xf32> to vector<1x64xf32>
    %5 = vector.broadcast %4 : vector<1x64xf32> to vector<8x64xf32>
    %6 = arith.addf %3, %5 : vector<8x64xf32>
    %cst_5 = arith.constant 0.000000e+00 : f32
    %7 = vector.broadcast %cst_5 : f32 to vector<8x64xf32>
    %8 = arith.cmpf oge, %6, %7 : vector<8x64xf32>
    %cst_6 = arith.constant 0.00999999977 : f32
    %9 = vector.broadcast %cst_6 : f32 to vector<8x64xf32>
    %10 = arith.mulf %9, %6 : vector<8x64xf32>
    %11 = arith.select %8, %6, %10 : vector<8x64xi1>, vector<8x64xf32>
    %cst_7 = arith.constant dense<0.000000e+00> : vector<8xf32>
    %12 = vector.multi_reduction <add>, %11, %cst_7 [1] : vector<8x64xf32> to vector<8xf32>
    %13 = vector.shape_cast %12 : vector<8xf32> to vector<8x1xf32>
    %cst_8 = arith.constant 1.562500e-02 : f32
    %14 = vector.broadcast %cst_8 : f32 to vector<8x1xf32>
    %15 = arith.mulf %13, %14 : vector<8x1xf32>
    %16 = vector.broadcast %15 : vector<8x1xf32> to vector<8x64xf32>
    %17 = arith.subf %11, %16 : vector<8x64xf32>
    %18 = arith.mulf %17, %17 : vector<8x64xf32>
    %cst_9 = arith.constant dense<0.000000e+00> : vector<8xf32>
    %19 = vector.multi_reduction <add>, %18, %cst_9 [1] : vector<8x64xf32> to vector<8xf32>
    %20 = vector.shape_cast %19 : vector<8xf32> to vector<8x1xf32>
    %cst_10 = arith.constant 1.562500e-02 : f32
    %21 = vector.broadcast %cst_10 : f32 to vector<8x1xf32>
    %22 = arith.mulf %20, %21 : vector<8x1xf32>
    %cst_11 = arith.constant 9.99999974E-6 : f32
    %23 = vector.broadcast %cst_11 : f32 to vector<8x1xf32>
    %24 = arith.addf %22, %23 : vector<8x1xf32>
    %25 = math.rsqrt %24 : vector<8x1xf32>
    %26 = vector.broadcast %25 : vector<8x1xf32> to vector<8x64xf32>
    %27 = arith.mulf %17, %26 : vector<8x64xf32>
    %28 = vector.extract_strided_slice %1 {offsets = [1, 0], sizes = [1, 64], strides = [1, 1]} : vector<3x64xf32> to vector<1x64xf32>
    %29 = vector.broadcast %28 : vector<1x64xf32> to vector<8x64xf32>
    %30 = arith.mulf %27, %29 : vector<8x64xf32>
    %31 = vector.extract_strided_slice %1 {offsets = [2, 0], sizes = [1, 64], strides = [1, 1]} : vector<3x64xf32> to vector<1x64xf32>
    %32 = vector.broadcast %31 : vector<1x64xf32> to vector<8x64xf32>
    %33 = arith.addf %30, %32 : vector<8x64xf32>
    %c0_12 = arith.constant 0 : index
    %c0_13 = arith.constant 0 : index
    %34 = vector.load %arg3[%c0_12, %c0_13] : memref<64x128xf32, #tpu.memory_space<vmem>>, vector<64x128xf32>
    %cst_14 = arith.constant dense<0.000000e+00> : vector<8x128xf32>
    %35 = tpu.matmul %33, %34, %cst_14 {dimension_numbers = #tpu.dot_dimension_numbers<[1], [0], [0], [1], [0, 0, 1, 1], [], []>} : vector<8x64xf32>, vector<64x128xf32>, vector<8x128xf32> -> vector<8x128xf32>
    %c0_15 = arith.constant 0 : index
    %c0_16 = arith.constant 0 : index
    %36 = vector.load %arg4[%c0_15, %c0_16] : memref<1x128xf32, #tpu.memory_space<vmem>>, vector<1x128xf32>
    %37 = vector.broadcast %36 : vector<1x128xf32> to vector<8x128xf32>
    %38 = arith.addf %35, %37 : vector<8x128xf32>
    %cst_17 = arith.constant 0.000000e+00 : f32
    %39 = vector.broadcast %cst_17 : f32 to vector<8x128xf32>
    %40 = arith.maximumf %38, %39 : vector<8x128xf32>
    %41 = math.absf %38 : vector<8x128xf32>
    %cst_18 = arith.constant 0.000000e+00 : f32
    %42 = vector.broadcast %cst_18 : f32 to vector<8x128xf32>
    %43 = arith.subf %42, %41 : vector<8x128xf32>
    %44 = math.exp %43 : vector<8x128xf32>
    %45 = math.log1p %44 : vector<8x128xf32>
    %46 = arith.addf %40, %45 : vector<8x128xf32>
    %cst_19 = arith.constant 1.000000e-03 : f32
    %47 = vector.broadcast %cst_19 : f32 to vector<8x128xf32>
    %48 = arith.maximumf %46, %47 : vector<8x128xf32>
    %49 = tpu.iota {dimensions = array<i32: 1>} : vector<8x128xi32>
    %c4_i32 = arith.constant 4 : i32
    %50 = vector.broadcast %c4_i32 : i32 to vector<8x128xi32>
    %51 = arith.cmpi slt, %49, %50 : vector<8x128xi32>
    %52 = arith.select %51, %38, %48 : vector<8x128xi1>, vector<8x128xf32>
    %c0_20 = arith.constant 0 : index
    %c0_21 = arith.constant 0 : index
    %53 = vector.load %arg5[%c0_20, %c0_21] : memref<8x128xf32, #tpu.memory_space<vmem>>, vector<8x128xf32>
    tpu.vector_store %arg5[%c0_20, %c0_21], %52 {strides = array<i32>} : memref<8x128xf32, #tpu.memory_space<vmem>>, vector<8x128xf32>,
    return
  }
}

</mosaic_0001>

<bundles_post_ra>
// kernel: tpu_custom_call.1
= control target key start
LH: loop header
LB: loop body
LE: loop exit
PB: predicated region body
PF: predicated region fallthrough
CT: control target
= control target key end

     0   :  { %10 = vsyncpa [#allocation3], 0  ;;  %s563_s0 = inlined_call_operand.hbm [shape: f32[8,16], index: 0, kind: input, shape index: {}]   ;;  %s564_s1 = inlined_call_operand.hbm [shape: f32[16,64], index: 1, kind: input, shape index: {}]   ;;  %s565_s2 = inlined_call_operand.vmem [shape: f32[3,64], index: 2, kind: input, shape index: {}]   ;;  %s566_s3 = inlined_call_operand.hbm [shape: f32[64,128], index: 3, kind: input, shape index: {}]   ;;  %s567_s4 = inlined_call_operand.vmem [shape: f32[1,128], index: 4, kind: input, shape index: {}]   ;;  %s568_s5 = inlined_call_operand.hbm [shape: f32[8,128], index: 5, kind: output, shape index: {}]  }
   0x1   :  { %11 = vsyncpa [#allocation6], 0 }
   0x2   :  { %12 = vsyncpa [#allocation4], 0  ;;  %s459_s18 = smov [#allocation5]   ;;  %s365_s22 = scalar_lea.hbm %s564_s1, 256 }
   0x3   :  { %s28_s19 = sshll.u32 %s459_s18, 4  ;;  %p366_p0 = scmp.ne.s32.totalorder %s564_s1, %s365_s22  ;;  %s29_s19 = int_to_ptr.vmem [resolvable:$true] %s28_s19 }
   0x4   :  { %p369_p1 = scmp.lt.u32.totalorder %s365_s22, %s564_s1 }
   0x6   :  { %p371_p2 = pnand %p369_p1, %p366_p0 }
   0x8   :  { %374 = shalt.err (!%p371_p2)
}
   0x9   :  { %s375_s27 = scalar_lea.vmem %s29_s19, 256  ;;  %p380_p4 = scmp.lt.s32.totalorder %s29_s19, %s29_s19 }
   0xa   :  { %p376_p3 = scmp.ne.s32.totalorder %s29_s19, %s375_s27  ;;  %p381_p5 = scmp.lt.s32.totalorder %s375_s27, %s375_s27 }
   0xc   :  { %p382_p6 = por %p381_p5, %p380_p4 }
   0xe   :  { %p383_p7 = pnand %p382_p6, %p376_p3 }
  0x10   :  { %386 = shalt.err (!%p383_p7)
}
  0x11   :  { %s460_s28 = smov 128   ;;  %s461_s29 = smov 8  }
  0x12   :  { %34 = dma.hbm_to_vmem [thread:$0]  %s564_s1, 256, %s29_s19, [#allocation6], %s460_s28, %s460_s28, %s461_s29  }
  0x13   :  { %s462_s7 = smov [#allocation2]   ;;  %s463_s9 = smov [#allocation7]  }
  0x14   :  { %s19_s8 = sshll.u32 %s462_s7, 4  ;;  %s42_s10 = sshll.u32 %s463_s9, 4  ;;  %s20_s8 = int_to_ptr.vmem [resolvable:$true] %s19_s8  ;;  %s43_s10 = int_to_ptr.vmem [resolvable:$true] %s42_s10 }
  0x15   :  { %s387_s13 = scalar_lea.hbm %s563_s0, 128 }
  0x16   :  { %p388_p8 = scmp.ne.s32.totalorder %s563_s0, %s387_s13  ;;  %p391_p9 = scmp.lt.u32.totalorder %s387_s13, %s563_s0 }
  0x18   :  { %p393_p10 = pnand %p391_p9, %p388_p8 }
  0x1a   :  { %396 = shalt.err (!%p393_p10)
}
  0x1b   :  { %s397_s1 = scalar_lea.vmem %s20_s8, 128  ;;  %p402_p12 = scmp.lt.s32.totalorder %s20_s8, %s20_s8 }
  0x1c   :  { %p398_p11 = scmp.ne.s32.totalorder %s20_s8, %s397_s1  ;;  %p403_p13 = scmp.lt.s32.totalorder %s397_s1, %s397_s1 }
  0x1e   :  { %p404_p0 = por %p403_p13, %p402_p12 }
  0x20   :  { %p405_p1 = pnand %p404_p0, %p398_p11 }
  0x22   :  { %408 = shalt.err (!%p405_p1)
}
  0x23   :  { %22 = dma.hbm_to_vmem [thread:$0]  %s563_s0, 128, %s20_s8, [#allocation3]  }
  0x24   :  { %s409_s22 = scalar_lea.hbm %s566_s3, 1024 }
  0x25   :  { %p410_p2 = scmp.ne.s32.totalorder %s566_s3, %s409_s22  ;;  %p413_p3 = scmp.lt.u32.totalorder %s409_s22, %s566_s3 }
  0x27   :  { %p415_p4 = pnand %p413_p3, %p410_p2 }
  0x29   :  { %418 = shalt.err (!%p415_p4)
}
  0x2a   :  { %s419_s27 = scalar_lea.vmem %s43_s10, 1024  ;;  %p424_p6 = scmp.lt.s32.totalorder %s43_s10, %s43_s10 }
  0x2b   :  { %p420_p5 = scmp.ne.s32.totalorder %s43_s10, %s419_s27  ;;  %p425_p7 = scmp.lt.s32.totalorder %s419_s27, %s419_s27 }
  0x2d   :  { %p426_p8 = por %p425_p7, %p424_p6 }
  0x2f   :  { %p427_p9 = pnand %p426_p8, %p420_p5 }
  0x31   :  { %430 = shalt.err (!%p427_p9)
}
  0x32   :  { %48 = dma.hbm_to_vmem [thread:$0]  %s566_s3, 1024, %s43_s10, [#allocation6], %s460_s28, %s460_s28, %s461_s29  }
  0x33   :  { %453 = dma.done.wait [#allocation3], 128  }
  0x34   :  { %454 = vsyncadd [#allocation3], 4294967168 }
  0x35   :  { %455 = dma.done.wait [#allocation6], 1280  }
  0x36   :  { %456 = vsyncadd [#allocation6], 4294966016  ;;  %v464_v0 = vmov 0.0|0.0   ;;  %vm465_vm0 = vmmov 0   ;;  %v466_v1 = vmov 0.0   ;;  %v62_v2 = vld [vmem:[#allocation5] sm:$0xff]  ;;  %v64_v6 = vlaneseq }
  0x37   :  { %335 = vmatprep.subr.bf16.mxu0 %v464_v0  ;;  %313 = vmatprep.mubr.msk.f32.mxu0 %vm465_vm0, %v466_v1  ;;  %v63_v3 = vld [vmem:[#allocation5 + $0x8] sm:$0xff]  ;;  %v60_v5 = vld [vmem:[#allocation2] sm:$0xff]  ;;  %vm68_vm1 = vcmask 130048   ;;  %vm145_vm3 = vcmask 523264   ;;  %v169_v22 = vld [vmem:[#allocation7] sm:$0xff] }
  0x38   :  { %338 = vmatprep.subr.bf16.mxu1 %v464_v0  ;;  %332 = vmatprep.mubr.msk.f32.mxu1 %vm465_vm0, %v466_v1  ;;  %v336_v4 = vpack.c.bf16 %v63_v3, %v62_v2  ;;  %v65_v7 = vshrl.u32 %v64_v6, 7  ;;  %v61_v9 = vld [vmem:[%s565_s2] sm:$0x7]  ;;  %v171_v25 = vld [vmem:[#allocation7 + $0x10] sm:$0xff]  ;;  %v172_v26 = vld [vmem:[#allocation7 + $0x18] sm:$0xff]  ;;  %v274_v60 = vand.u32 127, %v64_v6 }
  0x39   :  { %v170_v23 = vld [vmem:[#allocation7 + $0x8] sm:$0xff]  ;;  %v342_v27 = vpack.c.bf16 %v172_v26, %v171_v25  ;;  %v173_v28 = vld [vmem:[#allocation7 + $0x20] sm:$0xff]  ;;  %v175_v31 = vld [vmem:[#allocation7 + $0x30] sm:$0xff] }
  0x3a   :  { %337 = vmatpush3.bf16.msra.mxu0 %v336_v4  ;;  %v66_v8 = vsub.s32 0, %v65_v7  ;;  %v339_v24 = vpack.c.bf16 %v170_v23, %v169_v22  ;;  %v174_v29 = vld [vmem:[#allocation7 + $0x28] sm:$0xff]  ;;  %v176_v32 = vld [vmem:[#allocation7 + $0x38] sm:$0xff]  ;;  %v161_v37 = vsub.s32 1, %v65_v7  ;;  %v166_v38 = vsub.s32 2, %v65_v7 }
  0x3b   :  { %v345_v30 = vpack.c.bf16 %v174_v29, %v173_v28  ;;  %v348_v33 = vpack.c.bf16 %v176_v32, %v175_v31  ;;  %v295_v45 = vld [vmem:[%s567_s4] ss:$0 sm:$0xff]  ;;  %s467_s4 = smov [#allocation8]   ;;  %vm275_vm5 = vcmp.lt.s32.totalorder %v274_v60, 4 }
  0x3c   :  { %v67_v10 = vrot.slane %v61_v9, %v66_v8  ;;  %340 = vmatpush3.bf16.msra.mxu1 %v339_v24  ;;  %v162_v39 = vrot.slane %v61_v9, %v161_v37  ;;  %v167_v41 = vrot.slane %v61_v9, %v166_v38  ;;  %s284_s6 = sshll.u32 %s467_s4, 4  ;;  %s285_s6 = int_to_ptr.vmem [resolvable:$true] %s284_s6 }
  0x3d   :  { %314 = vmatmul.mubr.msk.f32.vlgmr.msra.gmra.mrb[0].mxu0 %vm68_vm1, %v60_v5  ;;  %341 = vmatprep.subr.bf16.mxu1 %v464_v0  ;;  %s431_s7 = scalar_lea.vmem %s285_s6, 128  ;;  %p436_p11 = scmp.lt.s32.totalorder %s285_s6, %s285_s6 }
  0x3e   :  { %p432_p10 = scmp.ne.s32.totalorder %s285_s6, %s431_s7  ;;  %p437_p12 = scmp.lt.s32.totalorder %s431_s7, %s431_s7 }
  0x40   :  { %343 = vmatpush3.bf16.msra.mxu1 %v342_v27  ;;  %p438_p13 = por %p437_p12, %p436_p11 }
  0x41   :  { %344 = vmatprep.subr.bf16.mxu1 %v464_v0 }
  0x42   :  { %p439_p0 = pnand %p438_p13, %p432_p10 }
  0x44   :  { %346 = vmatpush3.bf16.msra.mxu1 %v345_v30 }
  0x45   :  { %347 = vmatprep.subr.bf16.mxu1 %v464_v0 }
  0x48   :  { %349 = vmatpush3.bf16.msra.mxu1 %v348_v33 }
 0x110   :  { %v138_v11 = vpop.f32.mrb[0].mxu0 }
 0x111   :  { %v139_v12 = vadd.f32 %v138_v11, %v67_v10  ;;  %v315_v13 = vpop.f32.mrb[1].mxu0 }
 0x113   :  { %v143_v14 = vmul.f32 0.01, %v139_v12  ;;  %vm142_vm2 = vcmp.ge.f32.partialorder %v139_v12, 0.0 }
 0x115   :  { %v144_v15 = vsel %vm142_vm2, %v139_v12, %v143_v14 }
 0x116   :  { %v146_v16 = vsel %vm145_vm3, %v144_v15, 0.0 }
 0x117   :  { %147 = vadd.xlane.f32.xlu0 %v146_v16 }
 0x1a4   :  { %v148_v17 = vpop.xlane.xlu0 %147 }
 0x1a5   :  { %v149_v18 = vmul.f32 0.015625, %v148_v17 }
 0x1a7   :  { %v150_v19 = vsub.f32 %v144_v15, %v149_v18 }
 0x1a9   :  { %v151_v20 = vmul.f32 %v150_v19, %v150_v19 }
 0x1ab   :  { %v152_v21 = vsel %vm145_vm3, %v151_v20, 0.0 }
 0x1ac   :  { %153 = vadd.xlane.f32.xlu0 %v152_v21 }
 0x239   :  { %v154_v34 = vpop.xlane.xlu0 %153 }
 0x23a   :  { %v155_v35 = vmul.f32 0.015625, %v154_v34 }
 0x23c   :  { %v156_v36 = vadd.f32 1e-05, %v155_v35 }
 0x23e   :  { %359 = vrsqrt.f32 %v156_v36 }
 0x248   :  { %v360_v40 = vpop.eup %359 }
 0x249   :  { %v158_v42 = vmul.f32 %v360_v40, %v150_v19 }
 0x24b   :  { %v163_v43 = vmul.f32 %v162_v39, %v158_v42 }
 0x24d   :  { %v168_v44 = vadd.f32 %v167_v41, %v163_v43 }
 0x24f   :  { %333 = vmatmul.mubr.msk.f32.vlgmr.msra.gmra.mrb[0].mxu1 %vm145_vm3, %v168_v44 }
 0x322   :  { %v253_v46 = vpop.f32.mrb[0].mxu1 }
 0x323   :  { %v254_v47 = vadd.f32 %v295_v45, %v253_v46  ;;  %v334_v48 = vpop.f32.mrb[1].mxu1 }
 0x325   :  { %v258_v49 = vand.u32 2147483647, %v254_v47  ;;  %v257_v61 = vmax.f32 %v254_v47, 0.0 }
 0x327   :  { %v259_v50 = vsub.f32 0.0, %v258_v49 }
 0x329   :  { %v260_v51 = vmul.f32 1.442695, %v259_v50 }
 0x32b   :  { %361 = vpow2.f32 %v260_v51 }
 0x335   :  { %v362_v52 = vpop.eup %361 }
 0x336   :  { %v262_v53 = vadd.f32 1.0, %v362_v52  ;;  %v265_v54 = vmul.f32 -0.5, %v362_v52  ;;  %v268_v56 = vand.u32 2147483647, %v362_v52 }
 0x338   :  { %363 = vlog2.f32 %v262_v53  ;;  %v266_v55 = vadd.f32 1.0, %v265_v54  ;;  %vm269_vm4 = vcmp.lt.f32.partialorder %v268_v56, 0.0004427343 }
 0x33a   :  { %v267_v59 = vmul.f32 %v362_v52, %v266_v55 }
 0x342   :  { %v364_v57 = vpop.eup %363 }
 0x343   :  { %v264_v58 = vmul.f32 0.6931472, %v364_v57 }
 0x345   :  { %v270_v62 = vsel %vm269_vm4, %v267_v59, %v264_v58 }
 0x346   :  { %v271_v63 = vadd.f32 %v270_v62, %v257_v61 }
 0x348   :  { %v272_v0 = vmax.f32 %v271_v63, 0.001 }
 0x34a   :  { %v276_v1 = vsel %vm275_vm5, %v254_v47, %v272_v0 }
 0x34b   :  { %277 = vst [vmem:[#allocation8] sm:$0xff] %v276_v1 }
 0x34c   :  { %442 = shalt.err (!%p439_p0)
}
 0x34d   :  { %s443_s10 = scalar_lea.hbm %s568_s5, 128 }
 0x34e   :  { %p444_p1 = scmp.ne.s32.totalorder %s568_s5, %s443_s10  ;;  %p447_p2 = scmp.lt.u32.totalorder %s443_s10, %s568_s5 }
 0x350   :  { %p449_p3 = pnand %p447_p2, %p444_p1 }
 0x352   :  { %452 = shalt.err (!%p449_p3)
}
 0x353   :  { %287 = dma.vmem_to_hbm [thread:$0]  %s285_s6, 128, %s568_s5, [#allocation4]  }
 0x354   :  { %457 = dma.done.wait [#allocation4], 128  }
 0x355   :  { %458 = vsyncadd [#allocation4], 4294967168 }
 0x356   :  { %291 = vsyncpa [#allocation3], 1 }
 0x357   :  { %292 = vsyncpa [#allocation6], 1 }
 0x358   :  { %293 = vsyncpa [#allocation4], 1 }

</bundles_post_ra>
